<compile_context>
chip_gen: v6e
topology: v6e:2x2x1
jax: 0.10.0
libtpu: 0.0.40
codegen_flags: <defaults>
</compile_context>

<pallas_src>
import jax
import jax.numpy as jnp
from jax.experimental import pallas as pl
from jax.experimental.pallas import tpu as pltpu

_LANE = 128
_MAX_TM = 256  # row-tile size (multiple of 8); 256 keeps double-buffered tiles tiny


def _normalized_linear_kernel(x_ref, wt_ref, b_ref, o_ref):
    # x_ref:  (TM, K)   row tile of the input, native dtype (fed straight to the MXU)
    # wt_ref: (K,  TN)  full pre-transposed weight (lane-padded), VMEM-resident
    # b_ref:  (1,  TN)  bias (lane-padded)
    # o_ref:  (TM, TN)  output row tile (lane-dense)
    x = x_ref[...]
    y = jnp.dot(x, wt_ref[...], preferred_element_type=jnp.float32)   # (TM, TN) f32 acc
    y = y + b_ref[...].astype(jnp.float32)

    xf = x.astype(jnp.float32)
    norms = jnp.sum(xf * xf, axis=1, keepdims=True)                   # (TM, 1) squared L2
    inv = pl.reciprocal(norms, approx=False)                          # exact -> 1e-5 tol holds
    o_ref[...] = (y * inv).astype(o_ref.dtype)


def prepare_params(weight, bias):
    """One-time parameter prep (do at setup, NOT per call):
    transpose PyTorch-layout weight (out, in) -> (in, out) and zero-pad the
    out-feature axis up to a multiple of 128 lanes."""
    out_features, in_features = weight.shape
    tn = max(_LANE, ((out_features + _LANE - 1) // _LANE) * _LANE)
    wt = jnp.zeros((in_features, tn), dtype=weight.dtype).at[:, :out_features].set(weight.T)
    b2 = jnp.zeros((1, tn), dtype=bias.dtype).at[:, :out_features].set(bias.reshape(1, -1))
    return wt, b2, out_features


def normalized_linear(x, wt, b2, out_features):
    """x: (N, in_features) (or (N, ...) flattened, matching x.view(len(x), -1));
    wt: (in_features, TN_pad) pre-transposed+padded weight; b2: (1, TN_pad) padded bias.
    Returns (N, out_features)."""
    n = x.shape[0]
    x2 = x.reshape(n, -1)                         # matches x.view(len(x), -1)
    k = x2.shape[1]
    tn = wt.shape[1]

    tm = n if n <= _MAX_TM else _MAX_TM           # full batch if small, else 256-row tiles
    grid = (pl.cdiv(n, tm),)

    # Advisory cost estimate for the XLA scheduler.
    cost = pl.CostEstimate(
        flops=2 * n * k * tn,
        transcendentals=0,
        bytes_accessed=(x2.size * x2.dtype.itemsize
                        + wt.size * wt.dtype.itemsize
                        + b2.size * b2.dtype.itemsize
                        + n * tn * x2.dtype.itemsize),
    )

    # VMEM budget: double-buffered x/out tiles + resident weight/bias, with slack.
    # Capped well below v7x's 64 MiB per-core VMEM.
    itemsize = max(x2.dtype.itemsize, wt.dtype.itemsize)
    tile_bytes = (2 * tm * k + k * tn + 2 * tm * tn + tn) * itemsize
    vmem_limit = int(min(max(2 * tile_bytes, 32 * 1024 * 1024), 56 * 1024 * 1024))

    out_padded = pl.pallas_call(
        _normalized_linear_kernel,
        out_shape=jax.ShapeDtypeStruct((n, tn), x2.dtype),
        grid=grid,
        in_specs=[
            pl.BlockSpec((tm, k), lambda i: (i, 0)),    # x: tiled over rows (pipelined)
            pl.BlockSpec((k, tn), lambda i: (0, 0)),    # weight: DMA'd once, VMEM-resident
            pl.BlockSpec((1, tn), lambda i: (0, 0)),    # bias: VMEM-resident
        ],
        out_specs=pl.BlockSpec((tm, tn), lambda i: (i, 0)),
        compiler_params=pltpu.CompilerParams(
            dimension_semantics=("parallel",),          # rows are independent -> megacore
            vmem_limit_bytes=vmem_limit,
        ),
        cost_estimate=cost,
    )(x2, wt, b2)

    return out_padded[:, :out_features]


def _reference(x, weight, bias):
    # Pure-JAX reference mirroring the PyTorch forward.
    x_norms = jnp.sum(jnp.square(x.reshape(x.shape[0], -1)), axis=1, keepdims=True)
    y = x @ weight.T + bias
    return y / x_norms


if __name__ == "__main__":
    key = jax.random.PRNGKey(0)
    k_x, k_w, k_b = jax.random.split(key, 3)

    batch = 8
    in_features = 32
    out_features = 16

    x = jax.random.normal(k_x, (batch, in_features), dtype=jnp.float32)
    # Deterministic parameter init (PyTorch-style uniform(-1/sqrt(in), 1/sqrt(in)))
    bound = 1.0 / (in_features ** 0.5)
    weight = jax.random.uniform(k_w, (out_features, in_features),
                                minval=-bound, maxval=bound, dtype=jnp.float32)
    bias = jax.random.uniform(k_b, (out_features,),
                              minval=-bound, maxval=bound, dtype=jnp.float32)

    # One-time parameter prep (transpose + lane pad) — outside the hot path.
    wt, b2, out_f = prepare_params(weight, bias)

    out = normalized_linear(x, wt, b2, out_f)
    out = jax.block_until_ready(out)

    ref = _reference(x, weight, bias)
    assert out.shape == (batch, out_features)
    assert jnp.allclose(out, ref, atol=1e-5, rtol=1e-5), "mismatch vs reference"

    print("KERNEL_OK")
</pallas_src>

<mosaic_0001>
module attributes {stable_mosaic.version = 11 : i64} {
  func.func @_normalized_linear_kernel(%arg0: i32, %arg1: memref<8x32xf32, #tpu.memory_space<vmem>>, %arg2: memref<32x128xf32, #tpu.memory_space<vmem>>, %arg3: memref<1x128xf32, #tpu.memory_space<vmem>>, %arg4: memref<8x128xf32, #tpu.memory_space<vmem>>) attributes {dimension_semantics = [#tpu.dimension_semantics<parallel>], iteration_bounds = array<i64: 1>, scalar_prefetch = 0 : i64, scratch_operands = 0 : i64, tpu.core_type = #tpu.core_type<tc>, window_params = [{transform_indices = @transform_0, window_bounds = array<i64: 8, 32>}, {pipeline_mode = #tpu.pipeline_mode<synchronous>, transform_indices = @transform_1, window_bounds = array<i64: 32, 128>}, {pipeline_mode = #tpu.pipeline_mode<synchronous>, transform_indices = @transform_2, window_bounds = array<i64: 1, 128>}, {transform_indices = @transform_3, window_bounds = array<i64: 8, 128>}]} {
    %c0 = arith.constant 0 : index
    %c0_0 = arith.constant 0 : index
    %0 = vector.load %arg1[%c0, %c0_0] : memref<8x32xf32, #tpu.memory_space<vmem>>, vector<8x32xf32>
    %c0_1 = arith.constant 0 : index
    %c0_2 = arith.constant 0 : index
    %1 = vector.load %arg2[%c0_1, %c0_2] : memref<32x128xf32, #tpu.memory_space<vmem>>, vector<32x128xf32>
    %cst = arith.constant dense<0.000000e+00> : vector<8x128xf32>
    %2 = tpu.matmul %0, %1, %cst {dimension_numbers = #tpu.dot_dimension_numbers<[1], [0], [0], [1], [0, 0, 1, 1], [], []>} : vector<8x32xf32>, vector<32x128xf32>, vector<8x128xf32> -> vector<8x128xf32>
    %c0_3 = arith.constant 0 : index
    %c0_4 = arith.constant 0 : index
    %3 = vector.load %arg3[%c0_3, %c0_4] : memref<1x128xf32, #tpu.memory_space<vmem>>, vector<1x128xf32>
    %4 = vector.broadcast %3 : vector<1x128xf32> to vector<8x128xf32>
    %5 = arith.addf %2, %4 : vector<8x128xf32>
    %6 = arith.mulf %0, %0 : vector<8x32xf32>
    %cst_5 = arith.constant dense<0.000000e+00> : vector<8xf32>
    %7 = vector.multi_reduction <add>, %6, %cst_5 [1] : vector<8x32xf32> to vector<8xf32>
    %8 = vector.shape_cast %7 : vector<8xf32> to vector<8x1xf32>
    %9 = tpu.reciprocal %8 : vector<8x1xf32> -> vector<8x1xf32>
    %10 = vector.broadcast %9 : vector<8x1xf32> to vector<8x128xf32>
    %11 = arith.mulf %5, %10 : vector<8x128xf32>
    %c0_6 = arith.constant 0 : index
    %c0_7 = arith.constant 0 : index
    %12 = vector.load %arg4[%c0_6, %c0_7] : memref<8x128xf32, #tpu.memory_space<vmem>>, vector<8x128xf32>
    tpu.vector_store %arg4[%c0_6, %c0_7], %11 {strides = array<i32>} : memref<8x128xf32, #tpu.memory_space<vmem>>, vector<8x128xf32>,
    return
  }
  func.func @transform_0(%arg0: i32) -> (i32, i32) {
    %c0_i32 = arith.constant 0 : i32
    %c0_i32_0 = arith.constant 0 : i32
    return %arg0, %c0_i32 : i32, i32
  }
  func.func @transform_1(%arg0: i32) -> (i32, i32) {
    %c0_i32 = arith.constant 0 : i32
    %c0_i32_0 = arith.constant 0 : i32
    %c0_i32_1 = arith.constant 0 : i32
    return %c0_i32, %c0_i32_0 : i32, i32
  }
  func.func @transform_2(%arg0: i32) -> (i32, i32) {
    %c0_i32 = arith.constant 0 : i32
    %c0_i32_0 = arith.constant 0 : i32
    %c0_i32_1 = arith.constant 0 : i32
    return %c0_i32, %c0_i32_0 : i32, i32
  }
  func.func @transform_3(%arg0: i32) -> (i32, i32) {
    %c0_i32 = arith.constant 0 : i32
    %c0_i32_0 = arith.constant 0 : i32
    return %arg0, %c0_i32 : i32, i32
  }
}

</mosaic_0001>

<bundles_post_ra>
// kernel: tpu_custom_call.1
= control target key start
LH: loop header
LB: loop body
LE: loop exit
PB: predicated region body
PF: predicated region fallthrough
CT: control target
= control target key end

     0   :  { %8 = vsyncpa [#allocation3], 0  ;;  %s282_s0 = inlined_call_operand.hbm [shape: f32[8,32], index: 0, kind: input, shape index: {}]   ;;  %s283_s1 = inlined_call_operand.hbm [shape: f32[32,128], index: 1, kind: input, shape index: {}]   ;;  %s284_s2 = inlined_call_operand.vmem [shape: f32[1,128], index: 2, kind: input, shape index: {}]   ;;  %s285_s3 = inlined_call_operand.hbm [shape: f32[8,128], index: 3, kind: output, shape index: {}]  }
   0x1   :  { %9 = vsyncpa [#allocation6], 0 }
   0x2   :  { %10 = vsyncpa [#allocation4], 0  ;;  %s243_s12 = smov [#allocation2]   ;;  %s244_s14 = smov [#allocation5]  }
   0x3   :  { %s17_s13 = sshll.u32 %s243_s12, 4  ;;  %s26_s15 = sshll.u32 %s244_s14, 4  ;;  %s18_s13 = int_to_ptr.vmem [resolvable:$true] %s17_s13  ;;  %s27_s15 = int_to_ptr.vmem [resolvable:$true] %s26_s15 }
   0x4   :  { %s185_s16 = scalar_lea.vmem %s18_s13, 128  ;;  %p190_p1 = scmp.lt.s32.totalorder %s18_s13, %s18_s13 }
   0x5   :  { %p186_p0 = scmp.ne.s32.totalorder %s18_s13, %s185_s16  ;;  %p191_p2 = scmp.lt.s32.totalorder %s185_s16, %s185_s16 }
   0x7   :  { %p192_p3 = por %p191_p2, %p190_p1 }
   0x9   :  { %p193_p4 = pnand %p192_p3, %p186_p0 }
   0xb   :  { %196 = shalt.err (!%p193_p4)
}
   0xc   :  { %20 = dma.hbm_to_vmem [thread:$0]  %s282_s0, 128, %s18_s13, [#allocation3]  }
   0xd   :  { %s205_s19 = scalar_lea.vmem %s27_s15, 512  ;;  %p210_p6 = scmp.lt.s32.totalorder %s27_s15, %s27_s15 }
   0xe   :  { %p206_p5 = scmp.ne.s32.totalorder %s27_s15, %s205_s19  ;;  %p211_p7 = scmp.lt.s32.totalorder %s205_s19, %s205_s19 }
  0x10   :  { %p212_p8 = por %p211_p7, %p210_p6 }
  0x12   :  { %p213_p9 = pnand %p212_p8, %p206_p5 }
  0x14   :  { %216 = shalt.err (!%p213_p9)
}
  0x15   :  { %s245_s20 = smov 128   ;;  %s246_s21 = smov 8  }
  0x16   :  { %32 = dma.hbm_to_vmem [thread:$0]  %s283_s1, 512, %s27_s15, [#allocation6], %s245_s20, %s245_s20, %s246_s21  }
  0x17   :  { %237 = dma.done.wait [#allocation3], 128  }
  0x18   :  { %238 = vsyncadd [#allocation3], 4294967168 }
  0x19   :  { %239 = dma.done.wait [#allocation6], 512  }
  0x1a   :  { %240 = vsyncadd [#allocation6], 4294966784  ;;  %v247_v0 = vmov 0.0   ;;  %vm248_vm0 = vmmov 0   ;;  %v45_v1 = vld [vmem:[#allocation5 + $0x18] sm:$0xff]  ;;  %v44_v2 = vld [vmem:[#allocation5 + $0x10] sm:$0xff] }
  0x1b   :  { %157 = vmatprep.subr.mxu0 %v247_v0  ;;  %165 = vmatprep.mubr.msk.f32.mxu0 %vm248_vm0, %v247_v0  ;;  %v41_v3 = vld [vmem:[#allocation2] sm:$0xff]  ;;  %v43_v4 = vld [vmem:[#allocation5 + $0x8] sm:$0xff]  ;;  %vm53_vm1 = vcmask 261120   ;;  %v42_v6 = vld [vmem:[#allocation5] sm:$0xff]  ;;  %s249_s24 = smov [#allocation7]  }
  0x1c   :  { %158 = vmatpush3.msra.mxu0 %v45_v1  ;;  %v127_v5 = vmul.f32 %v41_v3, %v41_v3  ;;  %v150_v9 = vld [vmem:[%s284_s2] ss:$0 sm:$0xff]  ;;  %s140_s25 = sshll.u32 %s249_s24, 4  ;;  %s141_s25 = int_to_ptr.vmem [resolvable:$true] %s140_s25 }
  0x1d   :  { %159 = vmatprep.subr.mxu0 %v247_v0  ;;  %s217_s26 = scalar_lea.vmem %s141_s25, 128  ;;  %p222_p11 = scmp.lt.s32.totalorder %s141_s25, %s141_s25 }
  0x1e   :  { %160 = vmatpush3.msra.mxu0 %v44_v2  ;;  %v128_v7 = vsel %vm53_vm1, %v127_v5, 0.0  ;;  %p218_p10 = scmp.ne.s32.totalorder %s141_s25, %s217_s26  ;;  %p223_p12 = scmp.lt.s32.totalorder %s217_s26, %s217_s26 }
  0x1f   :  { %161 = vmatprep.subr.mxu0 %v247_v0  ;;  %129 = vadd.xlane.f32.xlu0 %v128_v7 }
  0x20   :  { %162 = vmatpush3.msra.mxu0 %v43_v4  ;;  %p224_p13 = por %p223_p12, %p222_p11 }
  0x21   :  { %163 = vmatprep.subr.mxu0 %v247_v0 }
  0x22   :  { %164 = vmatpush3.msra.mxu0 %v42_v6  ;;  %p225_p0 = pnand %p224_p13, %p218_p10 }
  0x23   :  { %166 = vmatmul.mubr.msk.f32.vlgmr.msra.gmra.mxu0 %vm53_vm1, %v41_v3 }
  0xa8   :  { %v130_v8 = vpop.xlane.xlu0 %129 }
  0xa9   :  { %175 = vrcp.f32 %v130_v8 }
  0xb6   :  { %v176_v10 = vpop.eup %175 }
  0xe3   :  { %v123_v11 = vpop.f32.mrf.mxu0 }
  0xe4   :  { %v124_v12 = vadd.f32 %v150_v9, %v123_v11 }
  0xe5   :  { %v167_v13 = vpop.f32.mrf.mxu0 }
  0xe6   :  { %v132_v14 = vmul.f32 %v176_v10, %v124_v12 }
  0xe8   :  { %133 = vst [vmem:[#allocation7] sm:$0xff] %v132_v14 }
  0xe9   :  { %228 = shalt.err (!%p225_p0)
}
  0xea   :  { %143 = dma.vmem_to_hbm [thread:$0]  %s141_s25, 128, %s285_s3, [#allocation4]  }
  0xeb   :  { %241 = dma.done.wait [#allocation4], 128  }
  0xec   :  { %242 = vsyncadd [#allocation4], 4294967168 }
  0xed   :  { %147 = vsyncpa [#allocation3], 1 }
  0xee   :  { %148 = vsyncpa [#allocation6], 1 }
  0xef   :  { %149 = vsyncpa [#allocation4], 1 }

</bundles_post_ra>
